<compile_context>
chip_gen: v7x
topology: tpu7x:2x2x1
jax: 0.10.0
libtpu: 0.0.40
codegen_flags: <defaults>
</compile_context>

<pallas_src>
import functools
import math

import jax
import jax.numpy as jnp
from jax.experimental import pallas as pl
from jax.experimental.pallas import tpu as pltpu


def _layernorm(x, gamma, beta, eps=1e-6):   # module uses nn.LayerNorm(..., eps=1e-06)
    mu = jnp.mean(x, axis=-1, keepdims=True)
    var = jnp.mean((x - mu) ** 2, axis=-1, keepdims=True)
    return (x - mu) * jax.lax.rsqrt(var + eps) * gamma + beta


def _softmax_lastdim(s):
    # f32 statistics; approx reciprocal uses the EUP slot (essentially free).
    s = s - jnp.max(s, axis=-1, keepdims=True)
    p = jnp.exp(s)
    return p * pl.reciprocal(jnp.sum(p, axis=-1, keepdims=True), approx=True)


def _head_attention(qh, kh, vh, kv_tile):
    """One attention head. qh/kh/vh: (bb, T, hd) bf16, qh pre-scaled by 1/sqrt(hd).

    Returns (bb, T, hd) f32.  For T > kv_tile uses online (flash-style) softmax over KV
    tiles so the live score tensor is at most (bb, T, kv_tile) f32.
    """
    bb, t, hd = qh.shape
    if t <= kv_tile:
        # Exact single-tile softmax (short sequences / demo path).
        s = jnp.einsum("bqd,bkd->bqk", qh, kh, preferred_element_type=jnp.float32)
        p = _softmax_lastdim(s)
        return jnp.einsum("bqk,bkd->bqd", p.astype(jnp.bfloat16), vh,
                          preferred_element_type=jnp.float32)

    n_tiles = pl.cdiv(t, kv_tile)
    m = jnp.full((bb, t, 1), -jnp.inf, jnp.float32)
    l = jnp.zeros((bb, t, 1), jnp.float32)
    acc = jnp.zeros((bb, t, hd), jnp.float32)
    for i in range(n_tiles):                        # static trip count, static slices
        lo = i * kv_tile
        hi = min(t, lo + kv_tile)
        s = jnp.einsum("bqd,bkd->bqk", qh, kh[:, lo:hi, :],
                       preferred_element_type=jnp.float32)
        m_new = jnp.maximum(m, jnp.max(s, axis=-1, keepdims=True))
        alpha = jnp.exp(m - m_new)                  # exp(-inf) = 0 handles the first tile
        p = jnp.exp(s - m_new)
        l = alpha * l + jnp.sum(p, axis=-1, keepdims=True)
        acc = alpha * acc + jnp.einsum("bqk,bkd->bqd", p.astype(jnp.bfloat16),
                                       vh[:, lo:hi, :],
                                       preferred_element_type=jnp.float32)
        m = m_new
    return acc * pl.reciprocal(l, approx=True)


def block_kernel(x_ref,
                 ln1_g_ref, ln1_b_ref,
                 wqkv_ref, bqkv_ref,
                 wp_ref, bp_ref,
                 ln2_g_ref, ln2_b_ref,
                 w1_ref, b1_ref, w2_ref, b2_ref,
                 o_ref,
                 *, n_head, kv_tile):
    bb, t, c = x_ref.shape
    hd = c // n_head
    scale = 1.0 / math.sqrt(hd)
    r = bb * t

    # (bb, T, C) -> (R, C); residual stream kept in f32.
    x = x_ref[...].astype(jnp.float32).reshape(r, c)

    # ---- attention branch ----
    h = _layernorm(x, ln1_g_ref[...], ln1_b_ref[...])
    hb = h.astype(jnp.bfloat16)

    # Fused QKV: one GEMM, then split by static lane slices.
    qkv = jnp.dot(hb, wqkv_ref[...], preferred_element_type=jnp.float32) + bqkv_ref[...]
    q = (qkv[:, 0 * c:1 * c] * scale).astype(jnp.bfloat16)   # fold 1/sqrt(hd) into q, bf16 once
    k = qkv[:, 1 * c:2 * c].astype(jnp.bfloat16)
    v = qkv[:, 2 * c:3 * c].astype(jnp.bfloat16)

    # Per-head attention (single-batch 3-D einsums); head outputs are accumulated directly
    # into the output projection -- no concatenate, only one head's temporaries live at once.
    y = jnp.zeros((r, c), jnp.float32)
    for head in range(n_head):
        sl = slice(head * hd, (head + 1) * hd)
        qh = q[:, sl].reshape(bb, t, hd)
        kh = k[:, sl].reshape(bb, t, hd)
        vh = v[:, sl].reshape(bb, t, hd)
        yh = _head_attention(qh, kh, vh, kv_tile).reshape(r, hd)
        y = y + jnp.dot(yh.astype(jnp.bfloat16), wp_ref[sl, :],
                        preferred_element_type=jnp.float32)
    x = x + y + bp_ref[...]                         # proj bias; resid_drop: identity

    # ---- MLP branch ----
    h2 = _layernorm(x, ln2_g_ref[...], ln2_b_ref[...]).astype(jnp.bfloat16)
    m = jnp.dot(h2, w1_ref[...], preferred_element_type=jnp.float32) + b1_ref[...]
    m = jnp.maximum(m, 0.0).astype(jnp.bfloat16)    # ReLU, bf16 into the second GEMM
    m = jnp.dot(m, w2_ref[...], preferred_element_type=jnp.float32) + b2_ref[...]
    x = x + m                                       # Dropout: identity (inference)

    o_ref[...] = x.reshape(bb, t, c).astype(o_ref.dtype)


def _tpu_vmem_capacity_bytes():
    """Per-core VMEM capacity; conservative default (v7x per-TC) if the query fails."""
    cap = 64 * 1024 * 1024
    try:
        cap = int(pltpu.get_tpu_info().vmem_capacity_bytes)
    except Exception:
        pass
    return cap


def _pick_block_b(B, T, vmem_cap_bytes):
    """Largest divisor of B whose block_b*T rows fit the per-generation row target,
    while keeping >= 2 grid steps (DMA/compute overlap; v7x dual-TC split)."""
    target_rows = 1024 if vmem_cap_bytes >= 96 * 1024 * 1024 else 512
    bb = max(1, min(B, max(1, target_rows // max(T, 1))))
    if B >= 2:
        bb = min(bb, B // 2)        # guarantee at least 2 grid steps
    while B % bb:
        bb -= 1
    return max(bb, 1)


def transformer_block(x, params, n_head, *, block_b=None, kv_tile=512,
                      single_buffer_weights=False):
    B, T, C = x.shape
    H = params["w1"].shape[1]   # block_exp * C

    # Fused QKV weight/bias: one weight DMA + one MXU GEMM instead of three.
    # (In a real model these would be stored pre-fused; here it is a one-time concat.)
    wqkv = jnp.concatenate([params["wq"], params["wk"], params["wv"]], axis=1)   # (C, 3C) bf16
    bqkv = jnp.concatenate([params["bq"], params["bk"], params["bv"]], axis=1)   # (1, 3C) f32

    vmem_cap = _tpu_vmem_capacity_bytes()
    if block_b is None:
        block_b = _pick_block_b(B, T, vmem_cap)
    assert B % block_b == 0
    nb = B // block_b

    def const_spec(shape):
        idx = lambda b: (0,) * len(shape)
        if single_buffer_weights:
            # Constant-index blocks are never re-fetched; single-buffering halves resident
            # weight VMEM (matters on v7x's 64 MiB/TC).  Off by default (see TODO above).
            return pl.BlockSpec(shape, idx, pipeline_mode=pl.Buffered(1))
        return pl.BlockSpec(shape, idx)

    in_specs = [
        pl.BlockSpec((block_b, T, C), lambda b: (b, 0, 0)),   # x (block_b sequences / step)
        const_spec((1, C)), const_spec((1, C)),               # ln1 gamma, beta (f32)
        const_spec((C, 3 * C)), const_spec((1, 3 * C)),       # fused Wqkv (bf16), bqkv (f32)
        const_spec((C, C)), const_spec((1, C)),               # Wproj, bproj
        const_spec((1, C)), const_spec((1, C)),               # ln2 gamma, beta
        const_spec((C, H)), const_spec((1, H)),               # W1, b1
        const_spec((H, C)), const_spec((1, C)),               # W2, b2
    ]

    kernel = functools.partial(block_kernel, n_head=n_head, kv_tile=kv_tile)

    return pl.pallas_call(
        kernel,
        out_shape=jax.ShapeDtypeStruct((B, T, C), x.dtype),   # bf16 in/out halves HBM traffic
        grid_spec=pltpu.PrefetchScalarGridSpec(
            num_scalar_prefetch=0,
            grid=(nb,),
            in_specs=in_specs,
            out_specs=pl.BlockSpec((block_b, T, C), lambda b: (b, 0, 0)),
        ),
        compiler_params=pltpu.CompilerParams(
            dimension_semantics=("parallel",),
            # generation-aware limit with headroom (not the full physical VMEM).
            vmem_limit_bytes=max(32 * 1024 * 1024, int(vmem_cap * 0.8)),
        ),
    )(x,
      params["ln1_g"], params["ln1_b"],
      wqkv, bqkv,
      params["wp"], params["bp"],
      params["ln2_g"], params["ln2_b"],
      params["w1"], params["b1"], params["w2"], params["b2"])


def reference_block(x, p, n_head):
    # pure-JAX f32 reference matching the PyTorch forward (dropout = identity, no mask)
    B, T, C = x.shape
    hd = C // n_head
    f32 = lambda a: a.astype(jnp.float32)

    def ln(z, g, b):
        mu = jnp.mean(z, -1, keepdims=True)
        var = jnp.mean((z - mu) ** 2, -1, keepdims=True)
        return (z - mu) / jnp.sqrt(var + 1e-6) * g + b

    x = f32(x)
    h = ln(x, f32(p["ln1_g"]), f32(p["ln1_b"]))
    q = h @ f32(p["wq"]) + f32(p["bq"])
    k = h @ f32(p["wk"]) + f32(p["bk"])
    v = h @ f32(p["wv"]) + f32(p["bv"])
    q = q.reshape(B, T, n_head, hd).transpose(0, 2, 1, 3)
    k = k.reshape(B, T, n_head, hd).transpose(0, 2, 1, 3)
    v = v.reshape(B, T, n_head, hd).transpose(0, 2, 1, 3)
    att = (q @ k.transpose(0, 1, 3, 2)) / math.sqrt(hd)
    att = jax.nn.softmax(att, axis=-1)
    y = (att @ v).transpose(0, 2, 1, 3).reshape(B, T, C)
    y = y @ f32(p["wp"]) + f32(p["bp"])
    x = x + y
    h2 = ln(x, f32(p["ln2_g"]), f32(p["ln2_b"]))
    m = jax.nn.relu(h2 @ f32(p["w1"]) + f32(p["b1"])) @ f32(p["w2"]) + f32(p["b2"])
    return x + m


def make_params(key, C, H):
    ks = jax.random.split(key, 12)
    s = 0.1

    def w(k, shape):  # big matrices in bf16 (halves VMEM/HBM traffic, full MXU rate)
        return (s * jax.random.normal(k, shape, jnp.float32)).astype(jnp.bfloat16)

    def b(k, shape):  # biases / LN params stay f32
        return s * jax.random.normal(k, shape, jnp.float32)

    return {
        "ln1_g": jnp.ones((1, C), jnp.float32),
        "ln1_b": jnp.zeros((1, C), jnp.float32),
        "wq": w(ks[0], (C, C)), "bq": b(ks[1], (1, C)),
        "wk": w(ks[2], (C, C)), "bk": b(ks[3], (1, C)),
        "wv": w(ks[4], (C, C)), "bv": b(ks[5], (1, C)),
        "wp": w(ks[6], (C, C)), "bp": b(ks[7], (1, C)),
        "ln2_g": jnp.ones((1, C), jnp.float32),
        "ln2_b": jnp.zeros((1, C), jnp.float32),
        "w1": w(ks[8], (C, H)), "b1": b(ks[9], (1, H)),
        "w2": w(ks[10], (H, C)), "b2": b(ks[11], (1, C)),
    }


if __name__ == "__main__":
    # Small correctness-check shapes.  NOTE: for real benchmarks use C, H multiples of 128
    # and bb*T a multiple of 8 so output stores are lane-dense (unmasked vst).
    B, T, C = 2, 8, 32
    n_head = 4
    block_exp = 4
    H = block_exp * C

    key = jax.random.PRNGKey(0)
    kx, kp = jax.random.split(key)
    # bf16 activation I/O; the same bf16-rounded values feed the f32 reference, so only the
    # kernel's bf16-MXU / approx-reciprocal numerics differ from the reference.
    x = jax.random.normal(kx, (B, T, C), jnp.float32).astype(jnp.bfloat16)
    params = make_params(kp, C, H)

    out = jax.block_until_ready(transformer_block(x, params, n_head))
    ref = reference_block(x, params, n_head)

    assert out.shape == ref.shape and out.dtype == x.dtype
    err = float(jnp.max(jnp.abs(out.astype(jnp.float32) - ref)))
    assert jnp.allclose(out.astype(jnp.float32), ref, atol=2.5e-2, rtol=2.5e-2), (
        f"max abs err {err:.4f}")
    print("KERNEL_OK")
</pallas_src>

<mosaic_0001>
module attributes {stable_mosaic.version = 11 : i64} {
  func.func @block_kernel(%arg0: i32, %arg1: memref<1x8x32xbf16, #tpu.memory_space<vmem>>, %arg2: memref<1x32xf32, #tpu.memory_space<vmem>>, %arg3: memref<1x32xf32, #tpu.memory_space<vmem>>, %arg4: memref<32x96xbf16, #tpu.memory_space<vmem>>, %arg5: memref<1x96xf32, #tpu.memory_space<vmem>>, %arg6: memref<32x32xbf16, #tpu.memory_space<vmem>>, %arg7: memref<1x32xf32, #tpu.memory_space<vmem>>, %arg8: memref<1x32xf32, #tpu.memory_space<vmem>>, %arg9: memref<1x32xf32, #tpu.memory_space<vmem>>, %arg10: memref<32x128xbf16, #tpu.memory_space<vmem>>, %arg11: memref<1x128xf32, #tpu.memory_space<vmem>>, %arg12: memref<128x32xbf16, #tpu.memory_space<vmem>>, %arg13: memref<1x32xf32, #tpu.memory_space<vmem>>, %arg14: memref<1x8x32xbf16, #tpu.memory_space<vmem>>) attributes {dimension_semantics = [#tpu.dimension_semantics<parallel>], iteration_bounds = array<i64: 2>, scalar_prefetch = 0 : i64, scratch_operands = 0 : i64, tpu.core_type = #tpu.core_type<tc>, window_params = [{transform_indices = @transform_0, window_bounds = array<i64: 1, 8, 32>}, {pipeline_mode = #tpu.pipeline_mode<synchronous>, transform_indices = @transform_1, window_bounds = array<i64: 1, 32>}, {pipeline_mode = #tpu.pipeline_mode<synchronous>, transform_indices = @transform_2, window_bounds = array<i64: 1, 32>}, {pipeline_mode = #tpu.pipeline_mode<synchronous>, transform_indices = @transform_3, window_bounds = array<i64: 32, 96>}, {pipeline_mode = #tpu.pipeline_mode<synchronous>, transform_indices = @transform_4, window_bounds = array<i64: 1, 96>}, {pipeline_mode = #tpu.pipeline_mode<synchronous>, transform_indices = @transform_5, window_bounds = array<i64: 32, 32>}, {pipeline_mode = #tpu.pipeline_mode<synchronous>, transform_indices = @transform_6, window_bounds = array<i64: 1, 32>}, {pipeline_mode = #tpu.pipeline_mode<synchronous>, transform_indices = @transform_7, window_bounds = array<i64: 1, 32>}, {pipeline_mode = #tpu.pipeline_mode<synchronous>, transform_indices = @transform_8, window_bounds = array<i64: 1, 32>}, {pipeline_mode = #tpu.pipeline_mode<synchronous>, transform_indices = @transform_9, window_bounds = array<i64: 32, 128>}, {pipeline_mode = #tpu.pipeline_mode<synchronous>, transform_indices = @transform_10, window_bounds = array<i64: 1, 128>}, {pipeline_mode = #tpu.pipeline_mode<synchronous>, transform_indices = @transform_11, window_bounds = array<i64: 128, 32>}, {pipeline_mode = #tpu.pipeline_mode<synchronous>, transform_indices = @transform_12, window_bounds = array<i64: 1, 32>}, {transform_indices = @transform_13, window_bounds = array<i64: 1, 8, 32>}]} {
    %c0 = arith.constant 0 : index
    %c0_0 = arith.constant 0 : index
    %c0_1 = arith.constant 0 : index
    %0 = vector.load %arg1[%c0, %c0_0, %c0_1] : memref<1x8x32xbf16, #tpu.memory_space<vmem>>, vector<1x8x32xbf16>
    %1 = arith.extf %0 : vector<1x8x32xbf16> to vector<1x8x32xf32>
    %2 = vector.shape_cast %1 : vector<1x8x32xf32> to vector<8x32xf32>
    %c0_2 = arith.constant 0 : index
    %c0_3 = arith.constant 0 : index
    %3 = vector.load %arg2[%c0_2, %c0_3] : memref<1x32xf32, #tpu.memory_space<vmem>>, vector<1x32xf32>
    %c0_4 = arith.constant 0 : index
    %c0_5 = arith.constant 0 : index
    %4 = vector.load %arg3[%c0_4, %c0_5] : memref<1x32xf32, #tpu.memory_space<vmem>>, vector<1x32xf32>
    %cst = arith.constant dense<0.000000e+00> : vector<8xf32>
    %5 = vector.multi_reduction <add>, %2, %cst [1] : vector<8x32xf32> to vector<8xf32>
    %6 = vector.shape_cast %5 : vector<8xf32> to vector<8x1xf32>
    %cst_6 = arith.constant 3.200000e+01 : f32
    %7 = vector.broadcast %cst_6 : f32 to vector<8x1xf32>
    %8 = arith.divf %6, %7 : vector<8x1xf32>
    %9 = vector.broadcast %8 : vector<8x1xf32> to vector<8x32xf32>
    %10 = arith.subf %2, %9 : vector<8x32xf32>
    %11 = arith.mulf %10, %10 : vector<8x32xf32>
    %cst_7 = arith.constant dense<0.000000e+00> : vector<8xf32>
    %12 = vector.multi_reduction <add>, %11, %cst_7 [1] : vector<8x32xf32> to vector<8xf32>
    %13 = vector.shape_cast %12 : vector<8xf32> to vector<8x1xf32>
    %cst_8 = arith.constant 3.200000e+01 : f32
    %14 = vector.broadcast %cst_8 : f32 to vector<8x1xf32>
    %15 = arith.divf %13, %14 : vector<8x1xf32>
    %16 = vector.broadcast %8 : vector<8x1xf32> to vector<8x32xf32>
    %17 = arith.subf %2, %16 : vector<8x32xf32>
    %cst_9 = arith.constant 9.99999997E-7 : f32
    %18 = vector.broadcast %cst_9 : f32 to vector<8x1xf32>
    %19 = arith.addf %15, %18 : vector<8x1xf32>
    %20 = math.rsqrt %19 : vector<8x1xf32>
    %21 = vector.broadcast %20 : vector<8x1xf32> to vector<8x32xf32>
    %22 = arith.mulf %17, %21 : vector<8x32xf32>
    %23 = vector.broadcast %3 : vector<1x32xf32> to vector<8x32xf32>
    %24 = arith.mulf %22, %23 : vector<8x32xf32>
    %25 = vector.broadcast %4 : vector<1x32xf32> to vector<8x32xf32>
    %26 = arith.addf %24, %25 : vector<8x32xf32>
    %27 = arith.truncf %26 : vector<8x32xf32> to vector<8x32xbf16>
    %c0_10 = arith.constant 0 : index
    %c0_11 = arith.constant 0 : index
    %28 = vector.load %arg4[%c0_10, %c0_11] : memref<32x96xbf16, #tpu.memory_space<vmem>>, vector<32x96xbf16>
    %cst_12 = arith.constant dense<0.000000e+00> : vector<8x96xf32>
    %29 = tpu.matmul %27, %28, %cst_12 {dimension_numbers = #tpu.dot_dimension_numbers<[1], [0], [0], [1], [0, 0, 1, 1], [], []>} : vector<8x32xbf16>, vector<32x96xbf16>, vector<8x96xf32> -> vector<8x96xf32>
    %c0_13 = arith.constant 0 : index
    %c0_14 = arith.constant 0 : index
    %30 = vector.load %arg5[%c0_13, %c0_14] : memref<1x96xf32, #tpu.memory_space<vmem>>, vector<1x96xf32>
    %31 = vector.broadcast %30 : vector<1x96xf32> to vector<8x96xf32>
    %32 = arith.addf %29, %31 : vector<8x96xf32>
    %33 = vector.extract_strided_slice %32 {offsets = [0, 0], sizes = [8, 32], strides = [1, 1]} : vector<8x96xf32> to vector<8x32xf32>
    %cst_15 = arith.constant 0.353553385 : f32
    %34 = vector.broadcast %cst_15 : f32 to vector<8x32xf32>
    %35 = arith.mulf %33, %34 : vector<8x32xf32>
    %36 = arith.truncf %35 : vector<8x32xf32> to vector<8x32xbf16>
    %37 = vector.extract_strided_slice %32 {offsets = [0, 32], sizes = [8, 32], strides = [1, 1]} : vector<8x96xf32> to vector<8x32xf32>
    %38 = arith.truncf %37 : vector<8x32xf32> to vector<8x32xbf16>
    %39 = vector.extract_strided_slice %32 {offsets = [0, 64], sizes = [8, 32], strides = [1, 1]} : vector<8x96xf32> to vector<8x32xf32>
    %40 = arith.truncf %39 : vector<8x32xf32> to vector<8x32xbf16>
    %cst_16 = arith.constant 0.000000e+00 : f32
    %41 = vector.broadcast %cst_16 : f32 to vector<8x32xf32>
    %42 = vector.extract_strided_slice %36 {offsets = [0, 0], sizes = [8, 8], strides = [1, 1]} : vector<8x32xbf16> to vector<8x8xbf16>
    %43 = vector.shape_cast %42 : vector<8x8xbf16> to vector<1x8x8xbf16>
    %44 = vector.extract_strided_slice %38 {offsets = [0, 0], sizes = [8, 8], strides = [1, 1]} : vector<8x32xbf16> to vector<8x8xbf16>
    %45 = vector.shape_cast %44 : vector<8x8xbf16> to vector<1x8x8xbf16>
    %46 = vector.extract_strided_slice %40 {offsets = [0, 0], sizes = [8, 8], strides = [1, 1]} : vector<8x32xbf16> to vector<8x8xbf16>
    %47 = vector.shape_cast %46 : vector<8x8xbf16> to vector<1x8x8xbf16>
    "tpu.trace_start"() <{level = 10 : i32, message = "bqd,bkd->bqk"}> : () -> ()
    %cst_17 = arith.constant dense<0.000000e+00> : vector<1x8x8xf32>
    %48 = tpu.matmul %43, %45, %cst_17 {dimension_numbers = #tpu.dot_dimension_numbers<[2], [2], [1], [1], [0, 0, 0, 1, 1, 1], [0], [0]>} : vector<1x8x8xbf16>, vector<1x8x8xbf16>, vector<1x8x8xf32> -> vector<1x8x8xf32>
    "tpu.trace_stop"() : () -> ()
    %cst_18 = arith.constant dense<0xFF800000> : vector<1x8xf32>
    %49 = vector.multi_reduction <maximumf>, %48, %cst_18 [2] : vector<1x8x8xf32> to vector<1x8xf32>
    %50 = vector.shape_cast %49 : vector<1x8xf32> to vector<1x8x1xf32>
    %51 = vector.broadcast %50 : vector<1x8x1xf32> to vector<1x8x8xf32>
    %52 = arith.subf %48, %51 : vector<1x8x8xf32>
    %53 = math.exp %52 : vector<1x8x8xf32>
    %cst_19 = arith.constant dense<0.000000e+00> : vector<1x8xf32>
    %54 = vector.multi_reduction <add>, %53, %cst_19 [2] : vector<1x8x8xf32> to vector<1x8xf32>
    %55 = vector.shape_cast %54 : vector<1x8xf32> to vector<1x8x1xf32>
    %56 = tpu.reciprocal %55 {approx = true} : vector<1x8x1xf32> -> vector<1x8x1xf32>
    %57 = vector.broadcast %56 : vector<1x8x1xf32> to vector<1x8x8xf32>
    %58 = arith.mulf %53, %57 : vector<1x8x8xf32>
    %59 = arith.truncf %58 : vector<1x8x8xf32> to vector<1x8x8xbf16>
    "tpu.trace_start"() <{level = 10 : i32, message = "bqk,bkd->bqd"}> : () -> ()
    %cst_20 = arith.constant dense<0.000000e+00> : vector<1x8x8xf32>
    %60 = tpu.matmul %59, %47, %cst_20 {dimension_numbers = #tpu.dot_dimension_numbers<[2], [1], [1], [2], [0, 0, 0, 1, 1, 2], [0], [0]>} : vector<1x8x8xbf16>, vector<1x8x8xbf16>, vector<1x8x8xf32> -> vector<1x8x8xf32>
    "tpu.trace_stop"() : () -> ()
    %61 = vector.shape_cast %60 : vector<1x8x8xf32> to vector<8x8xf32>
    %62 = arith.truncf %61 : vector<8x8xf32> to vector<8x8xbf16>
    %c0_21 = arith.constant 0 : index
    %c0_22 = arith.constant 0 : index
    %63 = vector.load %arg6[%c0_21, %c0_22] : memref<32x32xbf16, #tpu.memory_space<vmem>>, vector<8x32xbf16>
    %cst_23 = arith.constant dense<0.000000e+00> : vector<8x32xf32>
    %64 = tpu.matmul %62, %63, %cst_23 {dimension_numbers = #tpu.dot_dimension_numbers<[1], [0], [0], [1], [0, 0, 1, 1], [], []>} : vector<8x8xbf16>, vector<8x32xbf16>, vector<8x32xf32> -> vector<8x32xf32>
    %65 = arith.addf %41, %64 : vector<8x32xf32>
    %66 = vector.extract_strided_slice %36 {offsets = [0, 8], sizes = [8, 8], strides = [1, 1]} : vector<8x32xbf16> to vector<8x8xbf16>
    %67 = vector.shape_cast %66 : vector<8x8xbf16> to vector<1x8x8xbf16>
    %68 = vector.extract_strided_slice %38 {offsets = [0, 8], sizes = [8, 8], strides = [1, 1]} : vector<8x32xbf16> to vector<8x8xbf16>
    %69 = vector.shape_cast %68 : vector<8x8xbf16> to vector<1x8x8xbf16>
    %70 = vector.extract_strided_slice %40 {offsets = [0, 8], sizes = [8, 8], strides = [1, 1]} : vector<8x32xbf16> to vector<8x8xbf16>
    %71 = vector.shape_cast %70 : vector<8x8xbf16> to vector<1x8x8xbf16>
    "tpu.trace_start"() <{level = 10 : i32, message = "bqd,bkd->bqk"}> : () -> ()
    %cst_24 = arith.constant dense<0.000000e+00> : vector<1x8x8xf32>
    %72 = tpu.matmul %67, %69, %cst_24 {dimension_numbers = #tpu.dot_dimension_numbers<[2], [2], [1], [1], [0, 0, 0, 1, 1, 1], [0], [0]>} : vector<1x8x8xbf16>, vector<1x8x8xbf16>, vector<1x8x8xf32> -> vector<1x8x8xf32>
    "tpu.trace_stop"() : () -> ()
    %cst_25 = arith.constant dense<0xFF800000> : vector<1x8xf32>
    %73 = vector.multi_reduction <maximumf>, %72, %cst_25 [2] : vector<1x8x8xf32> to vector<1x8xf32>
    %74 = vector.shape_cast %73 : vector<1x8xf32> to vector<1x8x1xf32>
    %75 = vector.broadcast %74 : vector<1x8x1xf32> to vector<1x8x8xf32>
    %76 = arith.subf %72, %75 : vector<1x8x8xf32>
    %77 = math.exp %76 : vector<1x8x8xf32>
    %cst_26 = arith.constant dense<0.000000e+00> : vector<1x8xf32>
    %78 = vector.multi_reduction <add>, %77, %cst_26 [2] : vector<1x8x8xf32> to vector<1x8xf32>
    %79 = vector.shape_cast %78 : vector<1x8xf32> to vector<1x8x1xf32>
    %80 = tpu.reciprocal %79 {approx = true} : vector<1x8x1xf32> -> vector<1x8x1xf32>
    %81 = vector.broadcast %80 : vector<1x8x1xf32> to vector<1x8x8xf32>
    %82 = arith.mulf %77, %81 : vector<1x8x8xf32>
    %83 = arith.truncf %82 : vector<1x8x8xf32> to vector<1x8x8xbf16>
    "tpu.trace_start"() <{level = 10 : i32, message = "bqk,bkd->bqd"}> : () -> ()
    %cst_27 = arith.constant dense<0.000000e+00> : vector<1x8x8xf32>
    %84 = tpu.matmul %83, %71, %cst_27 {dimension_numbers = #tpu.dot_dimension_numbers<[2], [1], [1], [2], [0, 0, 0, 1, 1, 2], [0], [0]>} : vector<1x8x8xbf16>, vector<1x8x8xbf16>, vector<1x8x8xf32> -> vector<1x8x8xf32>
    "tpu.trace_stop"() : () -> ()
    %85 = vector.shape_cast %84 : vector<1x8x8xf32> to vector<8x8xf32>
    %86 = arith.truncf %85 : vector<8x8xf32> to vector<8x8xbf16>
    %c8 = arith.constant 8 : index
    %c0_28 = arith.constant 0 : index
    %87 = vector.load %arg6[%c8, %c0_28] : memref<32x32xbf16, #tpu.memory_space<vmem>>, vector<8x32xbf16>
    %cst_29 = arith.constant dense<0.000000e+00> : vector<8x32xf32>
    %88 = tpu.matmul %86, %87, %cst_29 {dimension_numbers = #tpu.dot_dimension_numbers<[1], [0], [0], [1], [0, 0, 1, 1], [], []>} : vector<8x8xbf16>, vector<8x32xbf16>, vector<8x32xf32> -> vector<8x32xf32>
    %89 = arith.addf %65, %88 : vector<8x32xf32>
    %90 = vector.extract_strided_slice %36 {offsets = [0, 16], sizes = [8, 8], strides = [1, 1]} : vector<8x32xbf16> to vector<8x8xbf16>
    %91 = vector.shape_cast %90 : vector<8x8xbf16> to vector<1x8x8xbf16>
    %92 = vector.extract_strided_slice %38 {offsets = [0, 16], sizes = [8, 8], strides = [1, 1]} : vector<8x32xbf16> to vector<8x8xbf16>
    %93 = vector.shape_cast %92 : vector<8x8xbf16> to vector<1x8x8xbf16>
    %94 = vector.extract_strided_slice %40 {offsets = [0, 16], sizes = [8, 8], strides = [1, 1]} : vector<8x32xbf16> to vector<8x8xbf16>
    %95 = vector.shape_cast %94 : vector<8x8xbf16> to vector<1x8x8xbf16>
    "tpu.trace_start"() <{level = 10 : i32, message = "bqd,bkd->bqk"}> : () -> ()
    %cst_30 = arith.constant dense<0.000000e+00> : vector<1x8x8xf32>
    %96 = tpu.matmul %91, %93, %cst_30 {dimension_numbers = #tpu.dot_dimension_numbers<[2], [2], [1], [1], [0, 0, 0, 1, 1, 1], [0], [0]>} : vector<1x8x8xbf16>, vector<1x8x8xbf16>, vector<1x8x8xf32> -> vector<1x8x8xf32>
    "tpu.trace_stop"() : () -> ()
    %cst_31 = arith.constant dense<0xFF800000> : vector<1x8xf32>
    %97 = vector.multi_reduction <maximumf>, %96, %cst_31 [2] : vector<1x8x8xf32> to vector<1x8xf32>
    %98 = vector.shape_cast %97 : vector<1x8xf32> to vector<1x8x1xf32>
    %99 = vector.broadcast %98 : vector<1x8x1xf32> to vector<1x8x8xf32>
    %100 = arith.subf %96, %99 : vector<1x8x8xf32>
    %101 = math.exp %100 : vector<1x8x8xf32>
    %cst_32 = arith.constant dense<0.000000e+00> : vector<1x8xf32>
    %102 = vector.multi_reduction <add>, %101, %cst_32 [2] : vector<1x8x8xf32> to vector<1x8xf32>
    %103 = vector.shape_cast %102 : vector<1x8xf32> to vector<1x8x1xf32>
    %104 = tpu.reciprocal %103 {approx = true} : vector<1x8x1xf32> -> vector<1x8x1xf32>
    %105 = vector.broadcast %104 : vector<1x8x1xf32> to vector<1x8x8xf32>
    %106 = arith.mulf %101, %105 : vector<1x8x8xf32>
    %107 = arith.truncf %106 : vector<1x8x8xf32> to vector<1x8x8xbf16>
    "tpu.trace_start"() <{level = 10 : i32, message = "bqk,bkd->bqd"}> : () -> ()
    %cst_33 = arith.constant dense<0.000000e+00> : vector<1x8x8xf32>
    %108 = tpu.matmul %107, %95, %cst_33 {dimension_numbers = #tpu.dot_dimension_numbers<[2], [1], [1], [2], [0, 0, 0, 1, 1, 2], [0], [0]>} : vector<1x8x8xbf16>, vector<1x8x8xbf16>, vector<1x8x8xf32> -> vector<1x8x8xf32>
    "tpu.trace_stop"() : () -> ()
    %109 = vector.shape_cast %108 : vector<1x8x8xf32> to vector<8x8xf32>
    %110 = arith.truncf %109 : vector<8x8xf32> to vector<8x8xbf16>
    %c16 = arith.constant 16 : index
    %c0_34 = arith.constant 0 : index
    %111 = vector.load %arg6[%c16, %c0_34] : memref<32x32xbf16, #tpu.memory_space<vmem>>, vector<8x32xbf16>
    %cst_35 = arith.constant dense<0.000000e+00> : vector<8x32xf32>
    %112 = tpu.matmul %110, %111, %cst_35 {dimension_numbers = #tpu.dot_dimension_numbers<[1], [0], [0], [1], [0, 0, 1, 1], [], []>} : vector<8x8xbf16>, vector<8x32xbf16>, vector<8x32xf32> -> vector<8x32xf32>
    %113 = arith.addf %89, %112 : vector<8x32xf32>
    %114 = vector.extract_strided_slice %36 {offsets = [0, 24], sizes = [8, 8], strides = [1, 1]} : vector<8x32xbf16> to vector<8x8xbf16>
    %115 = vector.shape_cast %114 : vector<8x8xbf16> to vector<1x8x8xbf16>
    %116 = vector.extract_strided_slice %38 {offsets = [0, 24], sizes = [8, 8], strides = [1, 1]} : vector<8x32xbf16> to vector<8x8xbf16>
    %117 = vector.shape_cast %116 : vector<8x8xbf16> to vector<1x8x8xbf16>
    %118 = vector.extract_strided_slice %40 {offsets = [0, 24], sizes = [8, 8], strides = [1, 1]} : vector<8x32xbf16> to vector<8x8xbf16>
    %119 = vector.shape_cast %118 : vector<8x8xbf16> to vector<1x8x8xbf16>
    "tpu.trace_start"() <{level = 10 : i32, message = "bqd,bkd->bqk"}> : () -> ()
    %cst_36 = arith.constant dense<0.000000e+00> : vector<1x8x8xf32>
    %120 = tpu.matmul %115, %117, %cst_36 {dimension_numbers = #tpu.dot_dimension_numbers<[2], [2], [1], [1], [0, 0, 0, 1, 1, 1], [0], [0]>} : vector<1x8x8xbf16>, vector<1x8x8xbf16>, vector<1x8x8xf32> -> vector<1x8x8xf32>
    "tpu.trace_stop"() : () -> ()
    %cst_37 = arith.constant dense<0xFF800000> : vector<1x8xf32>
    %121 = vector.multi_reduction <maximumf>, %120, %cst_37 [2] : vector<1x8x8xf32> to vector<1x8xf32>
    %122 = vector.shape_cast %121 : vector<1x8xf32> to vector<1x8x1xf32>
    %123 = vector.broadcast %122 : vector<1x8x1xf32> to vector<1x8x8xf32>
    %124 = arith.subf %120, %123 : vector<1x8x8xf32>
    %125 = math.exp %124 : vector<1x8x8xf32>
    %cst_38 = arith.constant dense<0.000000e+00> : vector<1x8xf32>
    %126 = vector.multi_reduction <add>, %125, %cst_38 [2] : vector<1x8x8xf32> to vector<1x8xf32>
    %127 = vector.shape_cast %126 : vector<1x8xf32> to vector<1x8x1xf32>
    %128 = tpu.reciprocal %127 {approx = true} : vector<1x8x1xf32> -> vector<1x8x1xf32>
    %129 = vector.broadcast %128 : vector<1x8x1xf32> to vector<1x8x8xf32>
    %130 = arith.mulf %125, %129 : vector<1x8x8xf32>
    %131 = arith.truncf %130 : vector<1x8x8xf32> to vector<1x8x8xbf16>
    "tpu.trace_start"() <{level = 10 : i32, message = "bqk,bkd->bqd"}> : () -> ()
    %cst_39 = arith.constant dense<0.000000e+00> : vector<1x8x8xf32>
    %132 = tpu.matmul %131, %119, %cst_39 {dimension_numbers = #tpu.dot_dimension_numbers<[2], [1], [1], [2], [0, 0, 0, 1, 1, 2], [0], [0]>} : vector<1x8x8xbf16>, vector<1x8x8xbf16>, vector<1x8x8xf32> -> vector<1x8x8xf32>
    "tpu.trace_stop"() : () -> ()
    %133 = vector.shape_cast %132 : vector<1x8x8xf32> to vector<8x8xf32>
    %134 = arith.truncf %133 : vector<8x8xf32> to vector<8x8xbf16>
    %c24 = arith.constant 24 : index
    %c0_40 = arith.constant 0 : index
    %135 = vector.load %arg6[%c24, %c0_40] : memref<32x32xbf16, #tpu.memory_space<vmem>>, vector<8x32xbf16>
    %cst_41 = arith.constant dense<0.000000e+00> : vector<8x32xf32>
    %136 = tpu.matmul %134, %135, %cst_41 {dimension_numbers = #tpu.dot_dimension_numbers<[1], [0], [0], [1], [0, 0, 1, 1], [], []>} : vector<8x8xbf16>, vector<8x32xbf16>, vector<8x32xf32> -> vector<8x32xf32>
    %137 = arith.addf %113, %136 : vector<8x32xf32>
    %138 = arith.addf %2, %137 : vector<8x32xf32>
    %c0_42 = arith.constant 0 : index
    %c0_43 = arith.constant 0 : index
    %139 = vector.load %arg7[%c0_42, %c0_43] : memref<1x32xf32, #tpu.memory_space<vmem>>, vector<1x32xf32>
    %140 = vector.broadcast %139 : vector<1x32xf32> to vector<8x32xf32>
    %141 = arith.addf %138, %140 : vector<8x32xf32>
    %c0_44 = arith.constant 0 : index
    %c0_45 = arith.constant 0 : index
    %142 = vector.load %arg8[%c0_44, %c0_45] : memref<1x32xf32, #tpu.memory_space<vmem>>, vector<1x32xf32>
    %c0_46 = arith.constant 0 : index
    %c0_47 = arith.constant 0 : index
    %143 = vector.load %arg9[%c0_46, %c0_47] : memref<1x32xf32, #tpu.memory_space<vmem>>, vector<1x32xf32>
    %cst_48 = arith.constant dense<0.000000e+00> : vector<8xf32>
    %144 = vector.multi_reduction <add>, %141, %cst_48 [1] : vector<8x32xf32> to vector<8xf32>
    %145 = vector.shape_cast %144 : vector<8xf32> to vector<8x1xf32>
    %cst_49 = arith.constant 3.200000e+01 : f32
    %146 = vector.broadcast %cst_49 : f32 to vector<8x1xf32>
    %147 = arith.divf %145, %146 : vector<8x1xf32>
    %148 = vector.broadcast %147 : vector<8x1xf32> to vector<8x32xf32>
    %149 = arith.subf %141, %148 : vector<8x32xf32>
    %150 = arith.mulf %149, %149 : vector<8x32xf32>
    %cst_50 = arith.constant dense<0.000000e+00> : vector<8xf32>
    %151 = vector.multi_reduction <add>, %150, %cst_50 [1] : vector<8x32xf32> to vector<8xf32>
    %152 = vector.shape_cast %151 : vector<8xf32> to vector<8x1xf32>
    %cst_51 = arith.constant 3.200000e+01 : f32
    %153 = vector.broadcast %cst_51 : f32 to vector<8x1xf32>
    %154 = arith.divf %152, %153 : vector<8x1xf32>
    %155 = vector.broadcast %147 : vector<8x1xf32> to vector<8x32xf32>
    %156 = arith.subf %141, %155 : vector<8x32xf32>
    %cst_52 = arith.constant 9.99999997E-7 : f32
    %157 = vector.broadcast %cst_52 : f32 to vector<8x1xf32>
    %158 = arith.addf %154, %157 : vector<8x1xf32>
    %159 = math.rsqrt %158 : vector<8x1xf32>
    %160 = vector.broadcast %159 : vector<8x1xf32> to vector<8x32xf32>
    %161 = arith.mulf %156, %160 : vector<8x32xf32>
    %162 = vector.broadcast %142 : vector<1x32xf32> to vector<8x32xf32>
    %163 = arith.mulf %161, %162 : vector<8x32xf32>
    %164 = vector.broadcast %143 : vector<1x32xf32> to vector<8x32xf32>
    %165 = arith.addf %163, %164 : vector<8x32xf32>
    %166 = arith.truncf %165 : vector<8x32xf32> to vector<8x32xbf16>
    %c0_53 = arith.constant 0 : index
    %c0_54 = arith.constant 0 : index
    %167 = vector.load %arg10[%c0_53, %c0_54] : memref<32x128xbf16, #tpu.memory_space<vmem>>, vector<32x128xbf16>
    %cst_55 = arith.constant dense<0.000000e+00> : vector<8x128xf32>
    %168 = tpu.matmul %166, %167, %cst_55 {dimension_numbers = #tpu.dot_dimension_numbers<[1], [0], [0], [1], [0, 0, 1, 1], [], []>} : vector<8x32xbf16>, vector<32x128xbf16>, vector<8x128xf32> -> vector<8x128xf32>
    %c0_56 = arith.constant 0 : index
    %c0_57 = arith.constant 0 : index
    %169 = vector.load %arg11[%c0_56, %c0_57] : memref<1x128xf32, #tpu.memory_space<vmem>>, vector<1x128xf32>
    %170 = vector.broadcast %169 : vector<1x128xf32> to vector<8x128xf32>
    %171 = arith.addf %168, %170 : vector<8x128xf32>
    %cst_58 = arith.constant 0.000000e+00 : f32
    %172 = vector.broadcast %cst_58 : f32 to vector<8x128xf32>
    %173 = arith.maximumf %171, %172 : vector<8x128xf32>
    %174 = arith.truncf %173 : vector<8x128xf32> to vector<8x128xbf16>
    %c0_59 = arith.constant 0 : index
    %c0_60 = arith.constant 0 : index
    %175 = vector.load %arg12[%c0_59, %c0_60] : memref<128x32xbf16, #tpu.memory_space<vmem>>, vector<128x32xbf16>
    %cst_61 = arith.constant dense<0.000000e+00> : vector<8x32xf32>
    %176 = tpu.matmul %174, %175, %cst_61 {dimension_numbers = #tpu.dot_dimension_numbers<[1], [0], [0], [1], [0, 0, 1, 1], [], []>} : vector<8x128xbf16>, vector<128x32xbf16>, vector<8x32xf32> -> vector<8x32xf32>
    %c0_62 = arith.constant 0 : index
    %c0_63 = arith.constant 0 : index
    %177 = vector.load %arg13[%c0_62, %c0_63] : memref<1x32xf32, #tpu.memory_space<vmem>>, vector<1x32xf32>
    %178 = vector.broadcast %177 : vector<1x32xf32> to vector<8x32xf32>
    %179 = arith.addf %176, %178 : vector<8x32xf32>
    %180 = arith.addf %141, %179 : vector<8x32xf32>
    %181 = vector.shape_cast %180 : vector<8x32xf32> to vector<1x8x32xf32>
    %182 = arith.truncf %181 : vector<1x8x32xf32> to vector<1x8x32xbf16>
    %c0_64 = arith.constant 0 : index
    %c0_65 = arith.constant 0 : index
    %c0_66 = arith.constant 0 : index
    %183 = vector.load %arg14[%c0_64, %c0_65, %c0_66] : memref<1x8x32xbf16, #tpu.memory_space<vmem>>, vector<1x8x32xbf16>
    tpu.vector_store %arg14[%c0_64, %c0_65, %c0_66], %182 {strides = array<i32>} : memref<1x8x32xbf16, #tpu.memory_space<vmem>>, vector<1x8x32xbf16>,
    return
  }
  func.func @transform_0(%arg0: i32) -> (i32, i32, i32) {
    %c0_i32 = arith.constant 0 : i32
    %c0_i32_0 = arith.constant 0 : i32
    %c0_i32_1 = arith.constant 0 : i32
    return %arg0, %c0_i32, %c0_i32_0 : i32, i32, i32
  }
  func.func @transform_1(%arg0: i32) -> (i32, i32) {
    %c0_i32 = arith.constant 0 : i32
    %c0_i32_0 = arith.constant 0 : i32
    %c0_i32_1 = arith.constant 0 : i32
    return %c0_i32, %c0_i32_0 : i32, i32
  }
  func.func @transform_2(%arg0: i32) -> (i32, i32) {
    %c0_i32 = arith.constant 0 : i32
    %c0_i32_0 = arith.constant 0 : i32
    %c0_i32_1 = arith.constant 0 : i32
    return %c0_i32, %c0_i32_0 : i32, i32
  }
  func.func @transform_3(%arg0: i32) -> (i32, i32) {
    %c0_i32 = arith.constant 0 : i32
    %c0_i32_0 = arith.constant 0 : i32
    %c0_i32_1 = arith.constant 0 : i32
    return %c0_i32, %c0_i32_0 : i32, i32
  }
  func.func @transform_4(%arg0: i32) -> (i32, i32) {
    %c0_i32 = arith.constant 0 : i32
    %c0_i32_0 = arith.constant 0 : i32
    %c0_i32_1 = arith.constant 0 : i32
    return %c0_i32, %c0_i32_0 : i32, i32
  }
  func.func @transform_5(%arg0: i32) -> (i32, i32) {
    %c0_i32 = arith.constant 0 : i32
    %c0_i32_0 = arith.constant 0 : i32
    %c0_i32_1 = arith.constant 0 : i32
    return %c0_i32, %c0_i32_0 : i32, i32
  }
  func.func @transform_6(%arg0: i32) -> (i32, i32) {
    %c0_i32 = arith.constant 0 : i32
    %c0_i32_0 = arith.constant 0 : i32
    %c0_i32_1 = arith.constant 0 : i32
    return %c0_i32, %c0_i32_0 : i32, i32
  }
  func.func @transform_7(%arg0: i32) -> (i32, i32) {
    %c0_i32 = arith.constant 0 : i32
    %c0_i32_0 = arith.constant 0 : i32
    %c0_i32_1 = arith.constant 0 : i32
    return %c0_i32, %c0_i32_0 : i32, i32
  }
  func.func @transform_8(%arg0: i32) -> (i32, i32) {
    %c0_i32 = arith.constant 0 : i32
    %c0_i32_0 = arith.constant 0 : i32
    %c0_i32_1 = arith.constant 0 : i32
    return %c0_i32, %c0_i32_0 : i32, i32
  }
  func.func @transform_9(%arg0: i32) -> (i32, i32) {
    %c0_i32 = arith.constant 0 : i32
    %c0_i32_0 = arith.constant 0 : i32
    %c0_i32_1 = arith.constant 0 : i32
    return %c0_i32, %c0_i32_0 : i32, i32
  }
  func.func @transform_10(%arg0: i32) -> (i32, i32) {
    %c0_i32 = arith.constant 0 : i32
    %c0_i32_0 = arith.constant 0 : i32
    %c0_i32_1 = arith.constant 0 : i32
    return %c0_i32, %c0_i32_0 : i32, i32
  }
  func.func @transform_11(%arg0: i32) -> (i32, i32) {
    %c0_i32 = arith.constant 0 : i32
    %c0_i32_0 = arith.constant 0 : i32
    %c0_i32_1 = arith.constant 0 : i32
    return %c0_i32, %c0_i32_0 : i32, i32
  }
  func.func @transform_12(%arg0: i32) -> (i32, i32) {
    %c0_i32 = arith.constant 0 : i32
    %c0_i32_0 = arith.constant 0 : i32
    %c0_i32_1 = arith.constant 0 : i32
    return %c0_i32, %c0_i32_0 : i32, i32
  }
  func.func @transform_13(%arg0: i32) -> (i32, i32, i32) {
    %c0_i32 = arith.constant 0 : i32
    %c0_i32_0 = arith.constant 0 : i32
    %c0_i32_1 = arith.constant 0 : i32
    return %arg0, %c0_i32, %c0_i32_0 : i32, i32, i32
  }
}

</mosaic_0001>

<bundles_post_ra>
// kernel: tpu_custom_call.1
= control target key start
LH: loop header
LB: loop body
LE: loop exit
PB: predicated region body
PF: predicated region fallthrough
CT: control target
= control target key end

     0   :  { %s2187_s0 = inlined_call_operand.vmem [shape: bf16[2,8,32], index: 0, kind: input, shape index: {}]   ;;  %s2188_s1 = inlined_call_operand.vmem [shape: f32[1,32], index: 1, kind: input, shape index: {}]   ;;  %s2189_s2 = inlined_call_operand.vmem [shape: f32[1,32], index: 2, kind: input, shape index: {}]   ;;  %s2190_s3 = inlined_call_operand.vmem [shape: bf16[32,96], index: 3, kind: input, shape index: {}]   ;;  %s2191_s4 = inlined_call_operand.vmem [shape: f32[1,96], index: 4, kind: input, shape index: {}]   ;;  %s2192_s5 = inlined_call_operand.vmem [shape: bf16[32,32], index: 5, kind: input, shape index: {}]   ;;  %s2193_s6 = inlined_call_operand.vmem [shape: f32[1,32], index: 6, kind: input, shape index: {}]   ;;  %s2194_s7 = inlined_call_operand.vmem [shape: f32[1,32], index: 7, kind: input, shape index: {}]   ;;  %s2195_s8 = inlined_call_operand.vmem [shape: f32[1,32], index: 8, kind: input, shape index: {}]   ;;  %s2196_s9 = inlined_call_operand.vmem [shape: bf16[32,128], index: 9, kind: input, shape index: {}]   ;;  %s2197_s10 = inlined_call_operand.vmem [shape: f32[1,128], index: 10, kind: input, shape index: {}]   ;;  %s2198_s11 = inlined_call_operand.vmem [shape: bf16[128,32], index: 11, kind: input, shape index: {}]   ;;  %s2199_s12 = inlined_call_operand.vmem [shape: f32[1,32], index: 12, kind: input, shape index: {}]   ;;  %s2200_s13 = inlined_call_operand.hbm [shape: bf16[2,8,32], index: 13, kind: output, shape index: {}]  }
   0x1   :  { %2201 = sst [smem:[#allocation5_spill]] %s2187_s0 }
   0x2   :  { %2202 = sst [smem:[#allocation6_spill]] %s2188_s1 }
   0x3   :  { %2203 = sst [smem:[#allocation7_spill]] %s2189_s2 }
   0x4   :  { %18 = vsyncpa [#allocation3], 0 }
   0x5   :  { %20 = vsyncpa [#allocation3 + $0x1], 0  ;;  %s1894_s25 = smov 0   ;;  %s1896_s26 = smov 0  }
   0x6   :  { %s1898_s27 = smov 0   ;;  %s1900_s28 = smov 0  }
   0x7 LB: > { %s1915_s29 = sadd.s32 4294967295, %s1808_s28   ;;  %s1471_s30 = sadd.s32 4294967294, %s1808_s28   ;;  %s1808_s28 = sphi %s1900_s28, %s2212_s28   ;;  %s1804_s27 = sphi %s1898_s27, %s2211_s27   ;;  %s1800_s26 = sphi %s1896_s26, %s2210_s26   ;;  %s1796_s25 = sphi %s1894_s25, %s2209_s25  }
   0x8   : > { %s1919_s14 = sadd.s32 1, %s1808_s28   ;;  %s311_s15 = sadd.s32 1, %s1804_s27 }
   0x9   : > { %s308_s16 = ssub.s32 %s1808_s28, %s1919_s14  ;;  %p321_p0 = scmp.ne.s32.totalorder %s1804_s27, %s1800_s26 }
   0xa   : > { %p309_p1 = scmp.eq.s32.totalorder %s308_s16, 0  ;;  %p322_p2 = scmp.eq.s32.totalorder %s1915_s29, 1 }
   0xb   : > { %p327_p3 = scmp.ne.s32.totalorder %s1800_s26, %s1796_s25  ;;  %p328_p4 = scmp.eq.s32.totalorder %s1471_s30, 1 }
   0xc   : > { %s1930_s17 = scalar_select %p309_p1, %s1804_s27, %s311_s15  }
   0xd   : > { %p1932_p5 = por %p322_p2, %p321_p0  ;;  %p1936_p6 = por %p328_p4, %p327_p3 }
   0xe   : > { %p1474_p7 = scmp.ge.s32.totalorder %s1808_s28, 1  ;;  %p389_p8 = scmp.lt.s32.totalorder %s1808_s28, 3 }
  0x10   : > { %p390_p9 = pnand %p1474_p7, %p389_p8 }
  0x11   : > { %p432_p10 = scmp.lt.s32.totalorder (!%p390_p9), %s1915_s29, 1  ;;  %vm441_vm0 = vcmask (!%p390_p9), 261120   ;;  %s2206_s0 = sld [smem:[#allocation5_spill]] (!%p390_p9)  ;;  %v1714_v8 = vld [vmem:[%s2190_s3] sm:$0xff] (!%p390_p9)   ;;  %v1810_v9 = vmov (!%p390_p9), 0.0   ;;  %vm1811_vm1 = vmmov (!%p390_p9), 0  }
  0x12   : > { %393 = sbr.rel (%p390_p9) target bundleno = 4233 (0x1089), region = 72  ;;  %1554 = vmatprep.subr.bf16.mxu1 (!%p390_p9), %v1810_v9  ;;  %1558 = vmatprep.mubr.msk.bf16.mxu1 (!%p390_p9), %vm1811_vm1, %v1810_v9  ;;  %v1715_v10 = vld [vmem:[%s2190_s3 + $0x8] sm:$0xff] (!%p390_p9)   ;;  %s2207_s1 = sld [smem:[#allocation6_spill]] (!%p390_p9)  ;;  %v1479_v21 = vld [vmem:[%s2191_s4] ss:$0 sm:$0xff] (!%p390_p9)  ;;  %vm543_vm2 = vcmask (!%p390_p9), 64512  }
  0x13   : > { %1555 = vmatpush3.bf16.msra.mxu1 (!%p390_p9), %v1714_v8  ;;  %1580 = vmatprep.subr.bf16.mxu0 (!%p390_p9), %v1810_v9  ;;  %s2208_s2 = sld [smem:[#allocation7_spill]] (!%p390_p9)  ;;  %s1812_s16 = smov (!%p390_p9), 64   ;;  %vm607_vm3 = vcmask (!%p390_p9), 1043456   ;;  %v652_v8 = vld [vmem:[%s2192_s5] sm:$0xf] (!%p390_p9)  ;;  %vm1396_vm4 = vcmask (!%p390_p9), 257024  }
  0x14   : > { %1556 = vmatprep.subr.bf16.mxu1 (!%p390_p9), %v1810_v9  ;;  %1582 = vmatprep.mubr.msk.bf16.mxu0 (!%p390_p9), %vm1811_vm1, %v1810_v9  ;;  %s1815_s22 = smov (!%p390_p9), 120   ;;  %s1816_s23 = smov (!%p390_p9), 56  }
  0x15   : > { %s1818_s30 = smov (!%p390_p9), 112   ;;  %s1819_s15 = smov (!%p390_p9), 48  }
  0x17   : > { %1557 = vmatpush3.bf16.msra.mxu1 (!%p390_p9), %v1715_v10 }
  0x18   : > { %1562 = vmatprep.subr.bf16.mxu1 (!%p390_p9), %v1810_v9  ;;  %v1477_v15 = vld [vmem:[%s2207_s1] ss:$0 sm:$0xff] (!%p390_p9) }
  0x19   : > { %s433_s20 = scalar_select %p432_p10, %s1915_s29, 1  ;;  %v1478_v17 = vld [vmem:[%s2208_s2] ss:$0 sm:$0xff] }
  0x1b   : > { %s1476_s21 = sshll.u32 %s433_s20, 2  ;;  %s1813_s20 = smov 96  }
  0x1c   : > { %s435_s24 = scalar_lea.vmem %s2206_s0, %s1476_s21  ;;  %s1814_s21 = smov 88  }
  0x1d   : > { %v437_v0 = vld [vmem:[%s435_s24] sm:$0xf]  ;;  %s1817_s24 = smov 80  }
  0x1e   : > { %v1947_v1 = vunpack.c.l.bf16 %v437_v0 }
  0x20   : > { %v442_v2 = vsel %vm441_vm0, %v1947_v1, 0.0 }
  0x21   : > { %443 = vadd.xlane.f32.xlu0 %v442_v2 }
  0xae   : > { %v444_v3 = vpop.xlane.xlu0 %443 }
  0xaf   : > { %v446_v4 = vmul.f32 0.03125, %v444_v3 }
  0xb1   : > { %v447_v5 = vsub.f32 %v1947_v1, %v446_v4  ;;  %v765_v4 = vld [vmem:[%s2192_s5 + $0x4] sm:$0xf] }
  0xb3   : > { %v448_v6 = vmul.f32 %v447_v5, %v447_v5 }
  0xb5   : > { %v449_v7 = vsel %vm441_vm0, %v448_v6, 0.0 }
  0xb6   : > { %450 = vadd.xlane.f32.xlu0 %v449_v7 }
 0x143   : > { %v451_v11 = vpop.xlane.xlu0 %450 }
 0x144   : > { %v452_v12 = vmul.f32 0.03125, %v451_v11 }
 0x146   : > { %v453_v13 = vadd.f32 1e-06, %v452_v12  ;;  %v816_v12 = vsel %vm607_vm3, %v652_v8, 0 }
 0x148   : > { %1726 = vrsqrt.f32 %v453_v13 }
 0x152   : > { %v1727_v14 = vpop.eup %1726 }
 0x153   : > { %v455_v16 = vmul.f32 %v1727_v14, %v447_v5  ;;  %v770_v5 = vsel %vm607_vm3, %v765_v4, 0 }
 0x155   : > { %v462_v18 = vmul.f32 %v1477_v15, %v455_v16 }
 0x157   : > { %v469_v19 = vadd.f32 %v1478_v17, %v462_v18 }
 0x159   : > { %v470_v20 = vpack.c.bf16 %v469_v19, %v469_v19 }
 0x15b   : > { %1559 = vmatmul.mubr.msk.bf16.vlgmr.msra.gmra.mrb[0].mxu1 %vm441_vm0, %v470_v20 }
 0x15c   : > { %1564 = vmatprep.mubr.msk.bf16.mxu1 %vm1811_vm1, %v1810_v9 }
 0x22e   : > { %v531_v22 = vpop.f32.mrb[0].mxu1 }
 0x22f   : > { %v532_v23 = vadd.f32 %v1479_v21, %v531_v22  ;;  %v1560_v24 = vpop.f32.mrb[1].mxu1 }
 0x230   : > { %v534_v25 = vpop.f32.mrb[2].mxu1 }
 0x231   : > { %v1979_v26 = vpack.c.bf16 %v532_v23, %v532_v23  ;;  %v1561_v27 = vpop.f32.mrb[3].mxu1  ;;  %v537_v30 = vmul.f32 0.35355338, %v532_v23 }
 0x233   : > { %602 = vrot.lane.b32.xlu0 %v1979_v26, %s1812_s16  ;;  %541 = vrot.lane.b32.xlu1 %v1979_v26, %s1813_s20  ;;  %v1985_v32 = vpack.c.bf16 %v537_v30, %v537_v30  ;;  %s1822_s16 = smov 40  }
 0x2a5   : > { %v542_v28 = vpop.permute.xlu1 %541  ;;  %v603_v31 = vpop.permute.xlu0 %602 }
 0x2a6   : > { %v548_v29 = vsel %vm543_vm2, %v542_v28, 0  ;;  %v609_v33 = vsel %vm607_vm3, %v603_v31, 0 }
 0x2a7   : > { %1563 = vmatpush3.bf16.xpose.msra.mxu1 %v548_v29 }
 0x2a8   : > { %1568 = vmatprep.subr.bf16.mxu1 %v1810_v9 }
 0x2ae   : > { %1565 = vmatmul.mubr.msk.bf16.vlgmr.msra.gmra.mrb[4].mxu1 %vm543_vm2, %v1985_v32 }
 0x2af   : > { %1569 = vmatpush3.bf16.msra.mxu1 %v609_v33  ;;  %1570 = vmatprep.mubr.msk.bf16.mxu1 %vm1811_vm1, %v1810_v9 }
 0x2b0   : > { %1574 = vmatprep.subr.bf16.mxu1 %v1810_v9 }
 0x381   : > { %v584_v34 = vpop.f32.mrb[4].mxu1 }
 0x382   : > { %v1566_v35 = vpop.f32.mrb[5].mxu1  ;;  %v590_v36 = vsel %vm543_vm2, %v584_v34, -inf }
 0x383   : > { %591 = vmax.xlane.f32.xlu1 %v590_v36  ;;  %v587_v37 = vpop.f32.mrb[6].mxu1 }
 0x384   : > { %v1567_v38 = vpop.f32.mrb[7].mxu1 }
 0x410   : > { %v592_v39 = vpop.xlane.xlu1 %591 }
 0x411   : > { %v593_v40 = vsub.f32 %v584_v34, %v592_v39 }
 0x413   : > { %v594_v41 = vmul.f32 1.442695, %v593_v40 }
 0x415   : > { %1728 = vpow2.f32 %v594_v41 }
 0x41f   : > { %v1729_v42 = vpop.eup %1728 }
 0x420   : > { %v596_v43 = vsel %vm543_vm2, %v1729_v42, 0.0 }
 0x421   : > { %597 = vadd.xlane.f32.xlu0 %v596_v43 }
 0x437   : > { %656 = vrot.lane.b32.xlu0 %v1979_v26, %s1814_s21 }
 0x43b   : > { %654 = vrot.lane.b32.xlu0 %v1985_v32, %s1815_s22  ;;  %s1512_s22 = sshll.u32 %s1915_s29, 6 }
 0x43c   : > { %s2145_s1 = scalar_lea.hbm %s2200_s13, %s1512_s22 }
 0x4ae   : > { %v598_v44 = vpop.xlane.xlu0 %597 }
 0x4af   : > { %1730 = vrcp.f32 %v598_v44 }
 0x4b2   : > { %v657_v47 = vpop.permute.xlu0 %656 }
 0x4b3   : > { %v662_v49 = vsel %vm543_vm2, %v657_v47, 0 }
 0x4b6   : > { %v655_v50 = vpop.permute.xlu0 %654 }
 0x4b9   : > { %v1731_v45 = vpop.eup %1730 }
 0x4ba   : > { %v600_v46 = vmul.f32 %v1731_v45, %v1729_v42 }
 0x4bc   : > { %v601_v48 = vpack.c.bf16 %v600_v46, %v600_v46 }
 0x4be   : > { %1571 = vmatmul.mubr.msk.bf16.vlgmr.msra.gmra.mrb[8].mxu1 %vm543_vm2, %v601_v48 }
 0x4bf   : > { %1575 = vmatpush3.bf16.xpose.msra.mxu1 %v662_v49  ;;  %1576 = vmatprep.mubr.msk.bf16.mxu1 %vm1811_vm1, %v1810_v9 }
 0x4c0   : > { %1586 = vmatprep.subr.bf16.mxu1 %v1810_v9 }
 0x4c6   : > { %1577 = vmatmul.mubr.msk.bf16.vlgmr.msra.gmra.mrb[12].mxu1 %vm543_vm2, %v655_v50 }
 0x4c7   : > { %1588 = vmatprep.mubr.msk.bf16.mxu1 %vm1811_vm1, %v1810_v9  ;;  %1587 = vmatpush3.bf16.msra.mxu1 %v770_v5 }
 0x4c8   : > { %1598 = vmatprep.subr.bf16.mxu1 %v1810_v9 }
 0x591   : > { %v645_v51 = vpop.f32.mrb[8].mxu1 }
 0x592   : > { %v1572_v52 = vpop.f32.mrb[9].mxu1  ;;  %v651_v14 = vpack.c.bf16 %v645_v51, %v645_v51 }
 0x593   : > { %v648_v53 = vpop.f32.mrb[10].mxu1 }
 0x594   : > { %v1573_v54 = vpop.f32.mrb[11].mxu1 }
 0x599   : > { %v698_v55 = vpop.f32.mrb[12].mxu1 }
 0x59a   : > { %v1578_v56 = vpop.f32.mrb[13].mxu1  ;;  %v704_v57 = vsel %vm543_vm2, %v698_v55, -inf }
 0x59b   : > { %705 = vmax.xlane.f32.xlu1 %v704_v57  ;;  %v701_v58 = vpop.f32.mrb[14].mxu1 }
 0x59c   : > { %v1579_v59 = vpop.f32.mrb[15].mxu1 }
 0x5ac   : > { %716 = vrot.lane.b32.xlu1 %v1979_v26, %s1816_s23  ;;  %s1820_s23 = smov 72  }
 0x5b0   : > { %860 = vrot.lane.b32.xlu1 %v1979_v26, %s1817_s24  ;;  %s1821_s24 = smov 104  }
 0x5b4   : > { %858 = vrot.lane.b32.xlu1 %v1985_v32, %s1818_s30 }
 0x628   : > { %v706_v60 = vpop.xlane.xlu1 %705 }
 0x629   : > { %v707_v61 = vsub.f32 %v698_v55, %v706_v60 }
 0x62b   : > { %v708_v62 = vmul.f32 1.442695, %v707_v61 }
 0x62c   : > { %v717_v63 = vpop.permute.xlu1 %716 }
 0x62d   : > { %1732 = vpow2.f32 %v708_v62  ;;  %v722_v0 = vsel %vm607_vm3, %v717_v63, 0 }
 0x62e   : > { %1581 = vmatpush3.bf16.msra.mxu0 %v722_v0 }
 0x62f   : > { %1592 = vmatprep.subr.bf16.mxu0 %v1810_v9 }
 0x630   : > { %v861_v16 = vpop.permute.xlu1 %860 }
 0x631   : > { %v866_v21 = vsel %vm543_vm2, %v861_v16, 0 }
 0x634   : > { %v859_v25 = vpop.permute.xlu1 %858 }
 0x637   : > { %v1733_v2 = vpop.eup %1732 }
 0x638   : > { %v710_v3 = vsel %vm543_vm2, %v1733_v2, 0.0 }
 0x639   : > { %711 = vadd.xlane.f32.xlu0 %v710_v3 }
 0x64f   : > { %920 = vrot.lane.b32.xlu0 %v1979_v26, %s1819_s15  ;;  %s429_s15 = sand.u32 1, %s1800_s26  }
 0x650   : > { %s1399_s20 = scalar_lea.sflag [#allocation3], %s429_s15 }
 0x6c6   : > { %v712_v6 = vpop.xlane.xlu0 %711 }
 0x6c7   : > { %1734 = vrcp.f32 %v712_v6 }
 0x6ca   : > { %v921_v13 = vpop.permute.xlu0 %920 }
 0x6cb   : > { %v926_v15 = vsel %vm607_vm3, %v921_v13, 0 }
 0x6d1   : > { %v1735_v7 = vpop.eup %1734 }
 0x6d2   : > { %v714_v10 = vmul.f32 %v1735_v7, %v1733_v2  ;;  %v1128_v7 = vld [vmem:[%s2192_s5 + $0xc] sm:$0xf] }
 0x6d4   : > { %v715_v11 = vpack.c.bf16 %v714_v10, %v714_v10 }
 0x6d6   : > { %1583 = vmatmul.mubr.msk.bf16.vlgmr.msra.gmra.mrb[0].mxu0 %vm543_vm2, %v715_v11 }
 0x6d7   : > { %1593 = vmatpush3.bf16.msra.mxu0 %v816_v12  ;;  %1594 = vmatprep.mubr.msk.bf16.mxu0 %vm1811_vm1, %v1810_v9 }
 0x6d8   : > { %1604 = vmatprep.subr.bf16.mxu0 %v1810_v9 }
 0x6de   : > { %1595 = vmatmul.mubr.msk.bf16.vlgmr.msra.gmra.mrb[4].mxu0 %vm543_vm2, %v651_v14 }
 0x6df   : > { %1605 = vmatpush3.bf16.msra.mxu0 %v926_v15  ;;  %1606 = vmatprep.mubr.msk.bf16.mxu0 %vm1811_vm1, %v1810_v9 }
 0x6e0   : > { %1616 = vmatprep.subr.bf16.mxu0 %v1810_v9 }
 0x7a9   : > { %v758_v17 = vpop.f32.mrb[0].mxu0 }
 0x7aa   : > { %v764_v18 = vpack.c.bf16 %v758_v17, %v758_v17  ;;  %v1584_v19 = vpop.f32.mrb[1].mxu0 }
 0x7ab   : > { %v761_v20 = vpop.f32.mrb[2].mxu0 }
 0x7ac   : > { %v1585_v22 = vpop.f32.mrb[3].mxu0  ;;  %1589 = vmatmul.mubr.msk.bf16.vlgmr.msra.gmra.mrb[16].mxu1 %vm543_vm2, %v764_v18 }
 0x7ad   : > { %1599 = vmatpush3.bf16.xpose.msra.mxu1 %v866_v21  ;;  %1600 = vmatprep.mubr.msk.bf16.mxu1 %vm1811_vm1, %v1810_v9 }
 0x7ae   : > { %1610 = vmatprep.subr.bf16.mxu1 %v1810_v9 }
 0x7b1   : > { %v852_v23 = vpop.f32.mrb[4].mxu0 }
 0x7b2   : > { %v1596_v24 = vpop.f32.mrb[5].mxu0 }
 0x7b3   : > { %v855_v27 = vpop.f32.mrb[6].mxu0 }
 0x7b4   : > { %v1597_v28 = vpop.f32.mrb[7].mxu0  ;;  %1601 = vmatmul.mubr.msk.bf16.vlgmr.msra.gmra.mrb[20].mxu1 %vm543_vm2, %v859_v25  ;;  %v1495_v27 = vld [vmem:[%s2193_s6] ss:$0 sm:$0xff] }
 0x7b5   : > { %1612 = vmatprep.mubr.msk.bf16.mxu1 %vm1811_vm1, %v1810_v9 }
 0x87f   : > { %v806_v29 = vpop.f32.mrb[16].mxu1 }
 0x880   : > { %v2039_v30 = vadd.f32 %v852_v23, %v806_v29  ;;  %v1590_v31 = vpop.f32.mrb[17].mxu1 }
 0x881   : > { %v809_v33 = vpop.f32.mrb[18].mxu1 }
 0x882   : > { %v1591_v34 = vpop.f32.mrb[19].mxu1 }
 0x887   : > { %v902_v35 = vpop.f32.mrb[20].mxu1 }
 0x888   : > { %v1602_v36 = vpop.f32.mrb[21].mxu1  ;;  %v908_v37 = vsel %vm543_vm2, %v902_v35, -inf }
 0x889   : > { %909 = vmax.xlane.f32.xlu1 %v908_v37  ;;  %v905_v38 = vpop.f32.mrb[22].mxu1 }
 0x88a   : > { %v1603_v39 = vpop.f32.mrb[23].mxu1 }
 0x88b   : > { %v1716_v39 = vld [vmem:[%s2196_s9] sm:$0xff]  }
 0x916   : > { %v910_v40 = vpop.xlane.xlu1 %909 }
 0x917   : > { %v911_v41 = vsub.f32 %v902_v35, %v910_v40  ;;  %v1718_v40 = vld [vmem:[%s2198_s11] sm:$0xff]  }
 0x919   : > { %v912_v42 = vmul.f32 1.442695, %v911_v41  ;;  %v1719_v41 = vld [vmem:[%s2198_s11 + $0x8] sm:$0xff]  }
 0x91b   : > { %1736 = vpow2.f32 %v912_v42  ;;  %v1720_v42 = vld [vmem:[%s2198_s11 + $0x10] sm:$0xff]  }
 0x925   : > { %v1737_v43 = vpop.eup %1736 }
 0x926   : > { %v914_v44 = vsel %vm543_vm2, %v1737_v43, 0.0 }
 0x927   : > { %915 = vadd.xlane.f32.xlu0 %v914_v44  ;;  %v1722_v44 = vld [vmem:[%s2198_s11 + $0x20] sm:$0xff]  }
 0x93d   : > { %1019 = vrot.lane.b32.xlu0 %v1979_v26, %s1820_s23 }
 0x941   : > { %1017 = vrot.lane.b32.xlu0 %v1985_v32, %s1821_s24  ;;  %v969_v32 = vld [vmem:[%s2192_s5 + $0x8] sm:$0xf] }
 0x942   : > { %v974_v52 = vsel %vm607_vm3, %v969_v32, 0  ;;  %v1497_v32 = vld [vmem:[%s2195_s8] ss:$0 sm:$0xff] }
 0x943   : > { %1611 = vmatpush3.bf16.msra.mxu1 %v974_v52 }
 0x944   : > { %1622 = vmatprep.subr.bf16.mxu1 %v1810_v9 }
 0x9b4   : > { %v916_v45 = vpop.xlane.xlu0 %915 }
 0x9b5   : > { %1738 = vrcp.f32 %v916_v45  ;;  %v1723_v45 = vld [vmem:[%s2198_s11 + $0x28] sm:$0xff]  }
 0x9b8   : > { %v1020_v48 = vpop.permute.xlu0 %1019 }
 0x9b9   : > { %v1025_v50 = vsel %vm543_vm2, %v1020_v48, 0 }
 0x9bc   : > { %v1018_v51 = vpop.permute.xlu0 %1017 }
 0x9bf   : > { %v1739_v46 = vpop.eup %1738 }
 0x9c0   : > { %v918_v47 = vmul.f32 %v1739_v46, %v1737_v43  ;;  %v1721_v43 = vld [vmem:[%s2198_s11 + $0x18] sm:$0xff]  }
 0x9c2   : > { %v919_v49 = vpack.c.bf16 %v918_v47, %v918_v47 }
 0x9c4   : > { %1607 = vmatmul.mubr.msk.bf16.vlgmr.msra.gmra.mrb[8].mxu0 %vm543_vm2, %v919_v49 }
 0x9c5   : > { %1617 = vmatpush3.bf16.xpose.msra.mxu0 %v1025_v50  ;;  %1618 = vmatprep.mubr.msk.bf16.mxu0 %vm1811_vm1, %v1810_v9  ;;  %v1496_v50 = vld [vmem:[%s2194_s7] ss:$0 sm:$0xff] }
 0x9c6   : > { %1628 = vmatprep.subr.bf16.mxu0 %v1810_v9 }
 0x9cc   : > { %1619 = vmatmul.mubr.msk.bf16.vlgmr.msra.gmra.mrb[12].mxu0 %vm543_vm2, %v1018_v51 }
 0x9cd   : > { %1630 = vmatprep.mubr.msk.bf16.mxu0 %vm1811_vm1, %v1810_v9 }
 0xa97   : > { %v962_v53 = vpop.f32.mrb[8].mxu0 }
 0xa98   : > { %v968_v54 = vpack.c.bf16 %v962_v53, %v962_v53  ;;  %v1608_v55 = vpop.f32.mrb[9].mxu0 }
 0xa99   : > { %v965_v56 = vpop.f32.mrb[10].mxu0  ;;  %v1724_v55 = vld [vmem:[%s2198_s11 + $0x30] sm:$0xff]  }
 0xa9a   : > { %v1609_v57 = vpop.f32.mrb[11].mxu0  ;;  %1613 = vmatmul.mubr.msk.bf16.vlgmr.msra.gmra.mrb[24].mxu1 %vm543_vm2, %v968_v54  ;;  %v1725_v56 = vld [vmem:[%s2198_s11 + $0x38] sm:$0xff]  }
 0xa9b   : > { %1624 = vmatprep.mubr.msk.bf16.mxu1 %vm1811_vm1, %v1810_v9  ;;  %v1498_v57 = vld [vmem:[%s2197_s10] ss:$0 sm:$0xff] }
 0xa9f   : > { %v1061_v58 = vpop.f32.mrb[12].mxu0 }
 0xaa0   : > { %v1620_v59 = vpop.f32.mrb[13].mxu0  ;;  %v1067_v60 = vsel %vm543_vm2, %v1061_v58, -inf }
 0xaa1   : > { %1068 = vmax.xlane.f32.xlu1 %v1067_v60  ;;  %v1064_v61 = vpop.f32.mrb[14].mxu0 }
 0xaa2   : > { %v1621_v62 = vpop.f32.mrb[15].mxu0 }
 0xab2   : > { %1079 = vrot.lane.b32.xlu1 %v1979_v26, %s1822_s16  ;;  %v1133_v26 = vsel %vm607_vm3, %v1128_v7, 0  ;;  %s1475_s16 = sshll.u32 %s429_s15, 2 }
 0xab3   : > { %1629 = vmatpush3.bf16.msra.mxu0 %v1133_v26  ;;  %s431_s23 = scalar_lea.vmem [#allocation2], %s1475_s16  ;;  %s1823_s16 = smov [#allocation2]  }
 0xab4   : > { %1642 = vmatprep.subr.bf16.mxu0 %v1810_v9  ;;  %s1412_s24 = sshll.u32 %s431_s23, 4  ;;  %s1750_s21 = sshll.u32 %s1823_s16, 4  ;;  %s2147_s24 = int_to_ptr.vmem [resolvable:$true] %s1412_s24  ;;  %s1751_s21 = int_to_ptr.vmem [resolvable:$false] %s1750_s21 }
 0xab5   : > { %s1746_s29 = scalar_lea.vmem %s2147_s24, 64  ;;  %s1752_s2 = scalar_lea.vmem %s1751_s21, 128 }
 0xab6   : > { %p1747_p11 = scmp.ne.s32.totalorder %s2147_s24, %s1746_s29  ;;  %p1753_p0 = scmp.lt.s32.totalorder %s2147_s24, %s1751_s21 }
 0xab7   : > { %p1754_p1 = scmp.lt.s32.totalorder %s1752_s2, %s1746_s29 }
 0xab8   : > { %p1748_p12 = pnand %p1747_p11, %p1932_p5 }
 0xab9   : > { %p1755_p2 = por %p1754_p1, %p1753_p0 }
 0xaba   : > { %p1749_p13 = pneg %p1748_p12 }
 0xabc   : > { %p1756_p3 = pnand %p1755_p2, %p1749_p13 }
 0xb2e   : > { %v1069_v63 = vpop.xlane.xlu1 %1068 }
 0xb2f   : > { %v1070_v0 = vsub.f32 %v1061_v58, %v1069_v63 }
 0xb31   : > { %v1071_v2 = vmul.f32 1.442695, %v1070_v0 }
 0xb32   : > { %v1080_v3 = vpop.permute.xlu1 %1079 }
 0xb33   : > { %1740 = vpow2.f32 %v1071_v2  ;;  %v1085_v4 = vsel %vm607_vm3, %v1080_v3, 0 }
 0xb34   : > { %1623 = vmatpush3.bf16.msra.mxu1 %v1085_v4 }
 0xb35   : > { %1634 = vmatprep.subr.bf16.mxu1 %v1810_v9 }
 0xb3d   : > { %v1741_v5 = vpop.eup %1740 }
 0xb3e   : > { %v1073_v6 = vsel %vm543_vm2, %v1741_v5, 0.0 }
 0xb3f   : > { %1074 = vadd.xlane.f32.xlu0 %v1073_v6 }
 0xb6d   : > { %v1010_v8 = vpop.f32.mrb[24].mxu1 }
 0xb6e   : > { %v1016_v10 = vadd.f32 %v1010_v8, %v2039_v30  ;;  %v1614_v11 = vpop.f32.mrb[25].mxu1 }
 0xb6f   : > { %v1013_v12 = vpop.f32.mrb[26].mxu1 }
 0xb70   : > { %v1615_v13 = vpop.f32.mrb[27].mxu1 }
 0xbcc   : > { %v1075_v14 = vpop.xlane.xlu0 %1074 }
 0xbcd   : > { %1742 = vrcp.f32 %v1075_v14 }
 0xbd7   : > { %v1743_v15 = vpop.eup %1742 }
 0xbd8   : > { %v1077_v16 = vmul.f32 %v1743_v15, %v1741_v5 }
 0xbda   : > { %v1078_v17 = vpack.c.bf16 %v1077_v16, %v1077_v16 }
 0xbdc   : > { %1625 = vmatmul.mubr.msk.bf16.vlgmr.msra.gmra.mrb[28].mxu1 %vm543_vm2, %v1078_v17 }
 0xbdd   : > { %1638 = vmatprep.mubr.msk.bf16.mxu1 %vm1811_vm1, %v1810_v9  ;;  %1635 = vmatpush3.bf16.msra.mxu1 %v1716_v39 }
 0xbde   : > { %1636 = vmatprep.subr.bf16.mxu1 %v1810_v9 }
 0xcaf   : > { %v1121_v18 = vpop.f32.mrb[28].mxu1 }
 0xcb0   : > { %v1127_v19 = vpack.c.bf16 %v1121_v18, %v1121_v18  ;;  %v1626_v20 = vpop.f32.mrb[29].mxu1 }
 0xcb1   : > { %v1124_v21 = vpop.f32.mrb[30].mxu1 }
 0xcb2   : > { %v1627_v22 = vpop.f32.mrb[31].mxu1  ;;  %1631 = vmatmul.mubr.msk.bf16.vlgmr.msra.gmra.mrb[16].mxu0 %vm543_vm2, %v1127_v19 }
 0xcb3   : > { %1658 = vmatprep.mubr.msk.bf16.mxu0 %vm1811_vm1, %v1810_v9  ;;  %1643 = vmatpush3.bf16.msra.mxu0 %v1718_v40 }
 0xcb4   : > { %1644 = vmatprep.subr.bf16.mxu0 %v1810_v9 }
 0xcb7   : > { %1645 = vmatpush3.bf16.msra.mxu0 %v1719_v41 }
 0xcb8   : > { %1646 = vmatprep.subr.bf16.mxu0 %v1810_v9 }
 0xcbb   : > { %1647 = vmatpush3.bf16.msra.mxu0 %v1720_v42 }
 0xcbc   : > { %1648 = vmatprep.subr.bf16.mxu0 %v1810_v9 }
 0xcbf   : > { %1649 = vmatpush3.bf16.msra.mxu0 %v1721_v43 }
 0xcc0   : > { %1650 = vmatprep.subr.bf16.mxu0 %v1810_v9 }
 0xcc3   : > { %1651 = vmatpush3.bf16.msra.mxu0 %v1722_v44 }
 0xcc4   : > { %1652 = vmatprep.subr.bf16.mxu0 %v1810_v9 }
 0xcc7   : > { %1653 = vmatpush3.bf16.msra.mxu0 %v1723_v45 }
 0xcc8   : > { %1654 = vmatprep.subr.bf16.mxu0 %v1810_v9 }
 0xccb   : > { %1655 = vmatpush3.bf16.msra.mxu0 %v1724_v55 }
 0xccc   : > { %1656 = vmatprep.subr.bf16.mxu0 %v1810_v9  ;;  %v1502_v9 = vld [vmem:[%s2199_s12] ss:$0 sm:$0xff] }
 0xccf   : > { %1657 = vmatpush3.bf16.msra.mxu0 %v1725_v56 }
 0xd85   : > { %v1169_v23 = vpop.f32.mrb[16].mxu0 }
 0xd86   : > { %v1175_v24 = vadd.f32 %v1169_v23, %v1016_v10  ;;  %v1632_v25 = vpop.f32.mrb[17].mxu0 }
 0xd87   : > { %v1172_v28 = vpop.f32.mrb[18].mxu0 }
 0xd88   : > { %v1176_v29 = vadd.f32 %v1175_v24, %v1947_v1  ;;  %v1633_v30 = vpop.f32.mrb[19].mxu0  ;;  %v1717_v1 = vld [vmem:[%s2196_s9 + $0x8] sm:$0xff]  }
 0xd89   : > { %1637 = vmatpush3.bf16.msra.mxu1 %v1717_v1 }
 0xd8a   : > { %v2082_v31 = vadd.f32 %v1495_v27, %v1176_v29 }
 0xd8c   : > { %v1187_v33 = vsel %vm441_vm0, %v2082_v31, 0.0 }
 0xd8d   : > { %1188 = vadd.xlane.f32.xlu1 %v1187_v33 }
 0xe1a   : > { %v1189_v34 = vpop.xlane.xlu1 %1188 }
 0xe1b   : > { %v1190_v35 = vmul.f32 0.03125, %v1189_v34 }
 0xe1d   : > { %v1191_v36 = vsub.f32 %v2082_v31, %v1190_v35 }
 0xe1f   : > { %v1192_v37 = vmul.f32 %v1191_v36, %v1191_v36 }
 0xe21   : > { %v1193_v38 = vsel %vm441_vm0, %v1192_v37, 0.0 }
 0xe22   : > { %1194 = vadd.xlane.f32.xlu0 %v1193_v38 }
 0xeaf   : > { %v1195_v46 = vpop.xlane.xlu0 %1194 }
 0xeb0   : > { %v1196_v47 = vmul.f32 0.03125, %v1195_v46 }
 0xeb2   : > { %v1197_v48 = vadd.f32 1e-06, %v1196_v47 }
 0xeb4   : > { %1744 = vrsqrt.f32 %v1197_v48 }
 0xebe   : > { %v1745_v49 = vpop.eup %1744 }
 0xebf   : > { %v1199_v51 = vmul.f32 %v1745_v49, %v1191_v36 }
 0xec1   : > { %v1206_v52 = vmul.f32 %v1496_v50, %v1199_v51 }
 0xec3   : > { %v1213_v53 = vadd.f32 %v1497_v32, %v1206_v52 }
 0xec5   : > { %v1214_v54 = vpack.c.bf16 %v1213_v53, %v1213_v53 }
 0xec7   : > { %1639 = vmatmul.mubr.msk.bf16.vlgmr.msra.gmra.mrb[32].mxu1 %vm441_vm0, %v1214_v54 }
 0xf9a   : > { %v1275_v58 = vpop.f32.mrb[32].mxu1 }
 0xf9b   : > { %v1276_v59 = vadd.f32 %v1498_v57, %v1275_v58  ;;  %v1640_v60 = vpop.f32.mrb[33].mxu1 }
 0xf9c   : > { %v1278_v61 = vpop.f32.mrb[34].mxu1 }
 0xf9d   : > { %v1281_v62 = vmax.f32 %v1276_v59, 0.0  ;;  %v1641_v63 = vpop.f32.mrb[35].mxu1 }
 0xf9f   : > { %v1282_v0 = vpack.c.bf16 %v1281_v62, %v1281_v62 }
 0xfa1   : > { %1659 = vmatmul.mubr.bf16.vlgmr.msra.gmra.mrb[20].mxu0 %v1282_v0 }
0x1074   : > { %v1388_v2 = vpop.f32.mrb[20].mxu0 }
0x1075   : > { %v1389_v3 = vadd.f32 %v1502_v9, %v1388_v2  ;;  %v1660_v4 = vpop.f32.mrb[21].mxu0 }
0x1076   : > { %v1391_v5 = vpop.f32.mrb[22].mxu0 }
0x1077   : > { %v1394_v6 = vadd.f32 %v1389_v3, %v2082_v31  ;;  %v1661_v7 = vpop.f32.mrb[23].mxu0 }
0x1079   : > { %v1395_v26 = vpack.c.bf16 %v1394_v6, %v1394_v6 }
0x107b   : > { %1397 = vst.msk [vmem:[%s431_s23] sm:$0xf] %vm1396_vm4, %v1395_v26 }
0x107c   : > { %1759 = shalt.err (!%p1756_p3)
}
0x107d   : > { %s1760_s0 = scalar_lea.hbm %s2145_s1, 64  ;;  %s1764_s23 = scalar_lea.hbm %s2200_s13, 128 }
0x107e   : > { %p1761_p4 = scmp.ne.s32.totalorder %s2145_s1, %s1760_s0  ;;  %p1765_p9 = scmp.lt.u32.totalorder %s2145_s1, %s2200_s13 }
0x107f   : > { %p1766_p10 = scmp.lt.u32.totalorder %s1764_s23, %s1760_s0  ;;  %p1768_p12 = scmp.lt.u32.totalorder %s1760_s0, %s2145_s1 }
0x1080   : > { %p1762_p7 = pnand %p1761_p4, %p1932_p5 }
0x1081   : > { %p1767_p11 = por %p1766_p10, %p1765_p9 }
0x1082   : > { %p1763_p8 = pneg %p1762_p7 }
0x1083   : > { %p1769_p13 = por %p1768_p12, %p1767_p11 }
0x1085   : > { %p1770_p0 = pnand %p1769_p13, %p1763_p8 }
0x1087   : > { %1773 = shalt.err (!%p1770_p0)
}
0x1088   : > { %1662 = dma.vmem_to_hbm [thread:$0]  (%p1932_p5), %s2147_s24, 64, %s2145_s1, %s1399_s20  }
0x1089 PF: > { %p1668_p1 = scmp.ge.s32.totalorder %s1808_s28, 2  ;;  %s1424_s2 = sand.u32 1, %s1796_s25  }
0x108a   : > { %s1425_s29 = scalar_lea.sflag [#allocation3], %s1424_s2 }
0x108b   : > { %p1665_p2 = pnand %p1668_p1, %p1936_p6 }
0x108d   : > { %1791 = dma.done.wait (!%p1665_p2), %s1425_s29, 64  }
0x108e   : > { %1793 = vsyncadd (!%p1665_p2), %s1425_s29, 4294967232  ;;  %p23_p3 = scmp.ge.s32.totalorder %s1919_s14, 4   ;;  %s2209_s25 = smov %s1800_s26 }
0x108f   : > { %s2210_s26 = smov %s1804_s27  ;;  %s2211_s27 = smov %s1930_s17 }
0x1090   : > { %s2212_s28 = smov %s1919_s14  ;;  %25 = sbr.rel (!%p23_p3) target bundleno = 7 (0x7), region = 107 }
0x1097   :  { %1430 = vsyncpa [#allocation3], 1 }
0x1098   :  { %1432 = vsyncpa [#allocation3 + $0x1], 1 }

</bundles_post_ra>
